<compile_context>
chip_gen: v6e
topology: v6e:2x2x1
jax: 0.10.0
libtpu: 0.0.40
codegen_flags: <defaults>
</compile_context>

<pallas_src>
import functools

import jax
import jax.numpy as jnp
from jax.experimental import pallas as pl
from jax.experimental.pallas import tpu as pltpu


def _const_block_spec(shape):
    """BlockSpec for an operand whose block index is constant across the grid.

    Requests single buffering (no double-buffer VMEM waste) when the running
    JAX version supports pipeline_mode; falls back to a plain BlockSpec.
    """
    idx_map = lambda n: (0,) * len(shape)
    buffered = getattr(pl, "Buffered", None)
    if buffered is not None:
        try:
            return pl.BlockSpec(shape, idx_map, pipeline_mode=buffered(1))
        except TypeError:  # older jax without pipeline_mode kwarg
            pass
    return pl.BlockSpec(shape, idx_map)


def _dec_block_kernel(x_ref, g_ref, b_ref, o_ref, *,
                      KH, H, OH, stride, padding, owc_pad):
    # x_ref: (NB, H, W*Cin) f32          g_ref: (W*Cin, KH*owc_pad) bf16
    # b_ref: (1, owc_pad)   f32          o_ref: (NB, stride*OH_q, owc_pad) f32
    nb, h, wcin = x_ref.shape

    # SiLU in f32 (v5e EUP has no bf16 path); cast only the MXU operand.
    x = x_ref[...].reshape(nb * h, wcin)
    xs = (x * jax.nn.sigmoid(x)).astype(jnp.bfloat16)

    # Step 1: one fused matmul over all KH taps (width scatter + channel
    # contraction):  u[(n,ih), kh*owc_pad + ow*Cout + co]
    #   = sum_{iw,ci} SiLU(x)[n,ih,iw,ci] * W[ci,co,kh, ow - iw*s + p]
    u = jnp.dot(xs, g_ref[...], preferred_element_type=jnp.float32)
    u3 = u.reshape(nb, h, KH * owc_pad)            # (NB, H, KH*owc_pad) f32

    # Step 2: height scatter oh = ih*stride - padding + kh, done as contiguous
    # exact-f32 adds into residue-class-major output rows:
    #   kernel row  (oh % stride) * OH_q + (oh // stride)   <->   oh
    oh_q = o_ref.shape[1] // stride                # rows per residue class
    o_ref[...] = jnp.broadcast_to(b_ref[...], o_ref.shape)
    for kh in range(KH):                           # static; KH is small
        d = (kh - padding) // stride               # row shift within class
        r = (kh - padding) % stride                # residue class
        ih_lo = max(0, -d)
        ih_hi = min(H - 1, (OH - 1 + padding - kh) // stride)
        cnt = ih_hi - ih_lo + 1
        if cnt <= 0:
            continue
        row0 = r * oh_q + ih_lo + d
        o_ref[:, row0:row0 + cnt, :] += (
            u3[:, ih_lo:ih_lo + cnt, kh * owc_pad:(kh + 1) * owc_pad])


def dec_block_forward(x_nchw, weight, bias, *, stride, padding):
    """weight: (Cin, Cout, KH, KW) as torch.nn.ConvTranspose2d; bias: (Cout,)."""
    N, Cin, H, W = x_nchw.shape
    cin_w, Cout, KH, KW = weight.shape
    assert cin_w == Cin
    s, p = stride, padding
    OH = (H - 1) * s - 2 * p + KH
    OW = (W - 1) * s - 2 * p + KW

    wcin = W * Cin
    owc = OW * Cout
    owc_pad = ((owc + 127) // 128) * 128           # lane-dense output / G chunks
    oh_q = -(-OH // s)                             # output rows per residue class
    rows = s * oh_q                                # kernel output rows (residue-major)

    # Images per grid step: fold the batch into the matmul M dimension and aim
    # for NB*H ~ 128 rows per step (pads the batch if N % NB != 0).
    nb = max(1, min(N, -(-128 // H)))
    n_pad = -(-N // nb) * nb

    # ---- layout + structured-weight prep (pure weight plumbing, plain JAX) ----
    # Compact channels-last input, width and channels merged onto lanes.
    x2d = jnp.transpose(x_nchw, (0, 2, 3, 1)).reshape(N, H, wcin)
    if n_pad != N:
        x2d = jnp.pad(x2d, ((0, n_pad - N), (0, 0), (0, 0)))

    # G[kh, iw*Cin+ci, ow*Cout+co] = weight[ci, co, kh, ow - iw*s + p]
    # (0 when the implied kw tap is out of range).  ConvTranspose: ow = iw*s-p+kw.
    kw_idx = jnp.arange(OW)[None, :] - jnp.arange(W)[:, None] * s + p   # (W, OW)
    valid = (kw_idx >= 0) & (kw_idx < KW)
    w_g = weight[:, :, :, jnp.clip(kw_idx, 0, KW - 1)]                  # (Cin,Cout,KH,W,OW)
    w_g = w_g * valid[None, None, None, :, :].astype(weight.dtype)
    g = jnp.transpose(w_g, (2, 3, 0, 4, 1)).reshape(KH, wcin, owc)
    g = jnp.pad(g, ((0, 0), (0, 0), (0, owc_pad - owc)))                # lane-pad chunks
    g_all = jnp.transpose(g, (1, 0, 2)).reshape(wcin, KH * owc_pad)     # fused weight
    g_all = g_all.astype(jnp.bfloat16)

    # Bias tiled to the lane-dense padded output layout.
    b_row = jnp.pad(jnp.tile(bias, OW), (0, owc_pad - owc))
    b_row = b_row.reshape(1, owc_pad).astype(jnp.float32)

    kernel = functools.partial(_dec_block_kernel, KH=KH, H=H, OH=OH,
                               stride=s, padding=p, owc_pad=owc_pad)

    out_raw = pl.pallas_call(
        kernel,
        out_shape=jax.ShapeDtypeStruct((n_pad, rows, owc_pad), jnp.float32),
        grid_spec=pltpu.PrefetchScalarGridSpec(
            num_scalar_prefetch=0,
            grid=(n_pad // nb,),
            in_specs=[
                pl.BlockSpec((nb, H, wcin), lambda n: (n, 0, 0)),
                _const_block_spec((wcin, KH * owc_pad)),
                _const_block_spec((1, owc_pad)),
            ],
            out_specs=pl.BlockSpec((nb, rows, owc_pad), lambda n: (n, 0, 0)),
        ),
        compiler_params=pltpu.CompilerParams(
            dimension_semantics=("parallel",),
            vmem_limit_bytes=32 * 1024 * 1024),
    )(x2d, g_all, b_row)

    # De-interleave residue classes: kernel row r*oh_q + q  ->  oh = q*s + r,
    # and drop the lane / row / batch padding (wrapper-side layout plumbing).
    out = out_raw[:, :, :owc].reshape(n_pad, s, oh_q, owc)
    out = jnp.transpose(out, (0, 2, 1, 3)).reshape(n_pad, oh_q * s, owc)
    out = out[:N, :OH].reshape(N, OH, OW, Cout).astype(x_nchw.dtype)
    return jnp.transpose(out, (0, 3, 1, 2))        # NHWC -> NCHW


def dec_block_ref(x_nchw, weight, bias, *, stride, padding):
    """Pure-JAX f32 reference for the same forward pass (via XLA conv)."""
    xs = x_nchw * jax.nn.sigmoid(x_nchw)
    Cin, Cout, KH, KW = weight.shape
    rhs = jnp.transpose(weight[:, :, ::-1, ::-1], (1, 0, 2, 3))  # (Cout,Cin,KH,KW)
    out = jax.lax.conv_general_dilated(
        xs, rhs, window_strides=(1, 1),
        padding=[(KH - 1 - padding, KH - 1 - padding),
                 (KW - 1 - padding, KW - 1 - padding)],
        lhs_dilation=(stride, stride),
        dimension_numbers=("NCHW", "OIHW", "NCHW"))
    return out + bias.reshape(1, Cout, 1, 1)


if __name__ == "__main__":
    # DecBlock(in_dim=8, out_dim=16, kernel_size=3, stride=2, padding=1)
    N, Cin, H, W = 2, 8, 8, 8
    Cout, K, stride, padding = 16, 3, 2, 1

    key = jax.random.PRNGKey(0)
    kx, kw, kb = jax.random.split(key, 3)
    x = jax.random.normal(kx, (N, Cin, H, W), dtype=jnp.float32)
    # deterministic ConvTranspose2d params (PyTorch shape: (Cin, Cout, KH, KW))
    fan = Cin * K * K
    bound = 1.0 / (fan ** 0.5)
    weight = jax.random.uniform(kw, (Cin, Cout, K, K), jnp.float32, -bound, bound)
    bias = jax.random.uniform(kb, (Cout,), jnp.float32, -bound, bound)

    out = dec_block_forward(x, weight, bias, stride=stride, padding=padding)
    out = jax.block_until_ready(out)

    ref = dec_block_ref(x, weight, bias, stride=stride, padding=padding)
    assert out.shape == ref.shape, (out.shape, ref.shape)
    # bf16 MXU operands with f32 accumulation (the height scatter is exact f32).
    assert jnp.allclose(out, ref, atol=2e-2, rtol=2e-2), float(
        jnp.max(jnp.abs(out - ref)))

    print("KERNEL_OK")
</pallas_src>

<mosaic_0001>
module attributes {stable_mosaic.version = 11 : i64} {
  func.func @_dec_block_kernel(%arg0: i32, %arg1: memref<2x8x64xf32, #tpu.memory_space<vmem>>, %arg2: memref<64x768xbf16, #tpu.memory_space<vmem>>, %arg3: memref<1x256xf32, #tpu.memory_space<vmem>>, %arg4: memref<2x16x256xf32, #tpu.memory_space<vmem>>) attributes {dimension_semantics = [#tpu.dimension_semantics<parallel>], iteration_bounds = array<i64: 1>, scalar_prefetch = 0 : i64, scratch_operands = 0 : i64, tpu.core_type = #tpu.core_type<tc>, window_params = [{transform_indices = @transform_0, window_bounds = array<i64: 2, 8, 64>}, {pipeline_mode = #tpu.pipeline_mode<synchronous>, transform_indices = @transform_1, window_bounds = array<i64: 64, 768>}, {pipeline_mode = #tpu.pipeline_mode<synchronous>, transform_indices = @transform_2, window_bounds = array<i64: 1, 256>}, {transform_indices = @transform_3, window_bounds = array<i64: 2, 16, 256>}]} {
    %c0 = arith.constant 0 : index
    %c0_0 = arith.constant 0 : index
    %c0_1 = arith.constant 0 : index
    %0 = vector.load %arg1[%c0, %c0_0, %c0_1] : memref<2x8x64xf32, #tpu.memory_space<vmem>>, vector<2x8x64xf32>
    %1 = vector.shape_cast %0 : vector<2x8x64xf32> to vector<16x64xf32>
    %2 = arith.negf %1 : vector<16x64xf32>
    %3 = math.exp %2 : vector<16x64xf32>
    %cst = arith.constant 1.000000e+00 : f32
    %4 = vector.broadcast %cst : f32 to vector<16x64xf32>
    %5 = arith.addf %4, %3 : vector<16x64xf32>
    %6 = arith.divf %4, %5 : vector<16x64xf32>
    %7 = arith.mulf %1, %6 : vector<16x64xf32>
    %8 = arith.truncf %7 : vector<16x64xf32> to vector<16x64xbf16>
    %c0_2 = arith.constant 0 : index
    %c0_3 = arith.constant 0 : index
    %9 = vector.load %arg2[%c0_2, %c0_3] : memref<64x768xbf16, #tpu.memory_space<vmem>>, vector<64x768xbf16>
    %cst_4 = arith.constant dense<0.000000e+00> : vector<16x768xf32>
    %10 = tpu.matmul %8, %9, %cst_4 {dimension_numbers = #tpu.dot_dimension_numbers<[1], [0], [0], [1], [0, 0, 1, 1], [], []>} : vector<16x64xbf16>, vector<64x768xbf16>, vector<16x768xf32> -> vector<16x768xf32>
    %11 = vector.shape_cast %10 : vector<16x768xf32> to vector<2x8x768xf32>
    %c0_5 = arith.constant 0 : index
    %c0_6 = arith.constant 0 : index
    %12 = vector.load %arg3[%c0_5, %c0_6] : memref<1x256xf32, #tpu.memory_space<vmem>>, vector<1x256xf32>
    %13 = vector.shape_cast %12 : vector<1x256xf32> to vector<1x1x256xf32>
    %14 = vector.broadcast %13 : vector<1x1x256xf32> to vector<2x16x256xf32>
    %c0_7 = arith.constant 0 : index
    %c0_8 = arith.constant 0 : index
    %c0_9 = arith.constant 0 : index
    %15 = vector.load %arg4[%c0_7, %c0_8, %c0_9] : memref<2x16x256xf32, #tpu.memory_space<vmem>>, vector<2x16x256xf32>
    tpu.vector_store %arg4[%c0_7, %c0_8, %c0_9], %14 {strides = array<i32>} : memref<2x16x256xf32, #tpu.memory_space<vmem>>, vector<2x16x256xf32>,
    %c0_10 = arith.constant 0 : index
    %c8 = arith.constant 8 : index
    %c0_11 = arith.constant 0 : index
    %16 = vector.load %arg4[%c0_10, %c8, %c0_11] : memref<2x16x256xf32, #tpu.memory_space<vmem>>, vector<2x7x256xf32>
    %17 = vector.extract_strided_slice %11 {offsets = [0, 1, 0], sizes = [2, 7, 256], strides = [1, 1, 1]} : vector<2x8x768xf32> to vector<2x7x256xf32>
    %18 = arith.addf %16, %17 : vector<2x7x256xf32>
    %c0_12 = arith.constant 0 : index
    %c8_13 = arith.constant 8 : index
    %c0_14 = arith.constant 0 : index
    %19 = vector.load %arg4[%c0_12, %c8_13, %c0_14] : memref<2x16x256xf32, #tpu.memory_space<vmem>>, vector<2x7x256xf32>
    tpu.vector_store %arg4[%c0_12, %c8_13, %c0_14], %18 {strides = array<i32>} : memref<2x16x256xf32, #tpu.memory_space<vmem>>, vector<2x7x256xf32>,
    %c0_15 = arith.constant 0 : index
    %c0_16 = arith.constant 0 : index
    %c0_17 = arith.constant 0 : index
    %20 = vector.load %arg4[%c0_15, %c0_16, %c0_17] : memref<2x16x256xf32, #tpu.memory_space<vmem>>, vector<2x8x256xf32>
    %21 = vector.extract_strided_slice %11 {offsets = [0, 0, 256], sizes = [2, 8, 256], strides = [1, 1, 1]} : vector<2x8x768xf32> to vector<2x8x256xf32>
    %22 = arith.addf %20, %21 : vector<2x8x256xf32>
    %c0_18 = arith.constant 0 : index
    %c0_19 = arith.constant 0 : index
    %c0_20 = arith.constant 0 : index
    %23 = vector.load %arg4[%c0_18, %c0_19, %c0_20] : memref<2x16x256xf32, #tpu.memory_space<vmem>>, vector<2x8x256xf32>
    tpu.vector_store %arg4[%c0_18, %c0_19, %c0_20], %22 {strides = array<i32>} : memref<2x16x256xf32, #tpu.memory_space<vmem>>, vector<2x8x256xf32>,
    %c0_21 = arith.constant 0 : index
    %c8_22 = arith.constant 8 : index
    %c0_23 = arith.constant 0 : index
    %24 = vector.load %arg4[%c0_21, %c8_22, %c0_23] : memref<2x16x256xf32, #tpu.memory_space<vmem>>, vector<2x7x256xf32>
    %25 = vector.extract_strided_slice %11 {offsets = [0, 0, 512], sizes = [2, 7, 256], strides = [1, 1, 1]} : vector<2x8x768xf32> to vector<2x7x256xf32>
    %26 = arith.addf %24, %25 : vector<2x7x256xf32>
    %c0_24 = arith.constant 0 : index
    %c8_25 = arith.constant 8 : index
    %c0_26 = arith.constant 0 : index
    %27 = vector.load %arg4[%c0_24, %c8_25, %c0_26] : memref<2x16x256xf32, #tpu.memory_space<vmem>>, vector<2x7x256xf32>
    tpu.vector_store %arg4[%c0_24, %c8_25, %c0_26], %26 {strides = array<i32>} : memref<2x16x256xf32, #tpu.memory_space<vmem>>, vector<2x7x256xf32>,
    return
  }
  func.func @transform_0(%arg0: i32) -> (i32, i32, i32) {
    %c0_i32 = arith.constant 0 : i32
    %c0_i32_0 = arith.constant 0 : i32
    %c0_i32_1 = arith.constant 0 : i32
    return %arg0, %c0_i32, %c0_i32_0 : i32, i32, i32
  }
  func.func @transform_1(%arg0: i32) -> (i32, i32) {
    %c0_i32 = arith.constant 0 : i32
    %c0_i32_0 = arith.constant 0 : i32
    %c0_i32_1 = arith.constant 0 : i32
    return %c0_i32, %c0_i32_0 : i32, i32
  }
  func.func @transform_2(%arg0: i32) -> (i32, i32) {
    %c0_i32 = arith.constant 0 : i32
    %c0_i32_0 = arith.constant 0 : i32
    %c0_i32_1 = arith.constant 0 : i32
    return %c0_i32, %c0_i32_0 : i32, i32
  }
  func.func @transform_3(%arg0: i32) -> (i32, i32, i32) {
    %c0_i32 = arith.constant 0 : i32
    %c0_i32_0 = arith.constant 0 : i32
    %c0_i32_1 = arith.constant 0 : i32
    return %arg0, %c0_i32, %c0_i32_0 : i32, i32, i32
  }
}

</mosaic_0001>

<bundles_post_ra>
// kernel: tpu_custom_call.1
= control target key start
LH: loop header
LB: loop body
LE: loop exit
PB: predicated region body
PF: predicated region fallthrough
CT: control target
= control target key end

     0   :  { %8 = vsyncpa [#allocation3], 0  ;;  %s618_s0 = inlined_call_operand.hbm [shape: f32[2,8,64], index: 0, kind: input, shape index: {}]   ;;  %s619_s1 = inlined_call_operand.hbm [shape: bf16[64,768], index: 1, kind: input, shape index: {}]   ;;  %s620_s2 = inlined_call_operand.vmem [shape: f32[1,256], index: 2, kind: input, shape index: {}]   ;;  %s621_s3 = inlined_call_operand.hbm [shape: f32[2,16,256], index: 3, kind: output, shape index: {}]  }
   0x1   :  { %9 = vsyncpa [#allocation6], 0 }
   0x2   :  { %10 = vsyncpa [#allocation4], 0  ;;  %s573_s12 = smov [#allocation2]  }
   0x3   :  { %s16_s13 = sshll.u32 %s573_s12, 4  ;;  %s17_s13 = int_to_ptr.vmem [resolvable:$true] %s16_s13 }
   0x4   :  { %s515_s14 = scalar_lea.vmem %s17_s13, 256  ;;  %p520_p1 = scmp.lt.s32.totalorder %s17_s13, %s17_s13 }
   0x5   :  { %p516_p0 = scmp.ne.s32.totalorder %s17_s13, %s515_s14  ;;  %p521_p2 = scmp.lt.s32.totalorder %s515_s14, %s515_s14 }
   0x7   :  { %p522_p3 = por %p521_p2, %p520_p1 }
   0x9   :  { %p523_p4 = pnand %p522_p3, %p516_p0 }
   0xb   :  { %526 = shalt.err (!%p523_p4)
}
   0xc   :  { %s574_s15 = smov 128   ;;  %s575_s16 = smov 8  }
   0xd   :  { %22 = dma.hbm_to_vmem [thread:$0]  %s618_s0, 256, %s17_s13, [#allocation3], %s574_s15, %s574_s15, %s575_s16  }
   0xe   :  { %s576_s19 = smov [#allocation5]  }
   0xf   :  { %s28_s20 = sshll.u32 %s576_s19, 4  ;;  %s29_s20 = int_to_ptr.vmem [resolvable:$true] %s28_s20 }
  0x10   :  { %s535_s21 = scalar_lea.vmem %s29_s20, 3072  ;;  %p540_p6 = scmp.lt.s32.totalorder %s29_s20, %s29_s20 }
  0x11   :  { %p536_p5 = scmp.ne.s32.totalorder %s29_s20, %s535_s21  ;;  %p541_p7 = scmp.lt.s32.totalorder %s535_s21, %s535_s21 }
  0x13   :  { %p542_p8 = por %p541_p7, %p540_p6 }
  0x15   :  { %p543_p9 = pnand %p542_p8, %p536_p5 }
  0x17   :  { %546 = shalt.err (!%p543_p9)
}
  0x18   :  { %s577_s22 = smov 384   ;;  %s578_s23 = smov 24  }
  0x19   :  { %34 = dma.hbm_to_vmem [thread:$0]  %s619_s1, 3072, %s29_s20, [#allocation6], %s577_s22, %s577_s22, %s578_s23  }
  0x1a   :  { %567 = dma.done.wait [#allocation3], 256  }
  0x1b   :  { %568 = vsyncadd [#allocation3], 4294967040 }
  0x1c   :  { %569 = dma.done.wait [#allocation6], 3072  }
  0x1d   :  { %570 = vsyncadd [#allocation6], 4294964224  ;;  %v579_v0 = vmov 0   ;;  %v463_v1 = vld [vmem:[#allocation5 + $0x94] ss:$24 sps:$4 sm:$0xff]   ;;  %v45_v14 = vld [vmem:[#allocation2 + $0x8] sm:$0xff]  ;;  %v340_v38 = vlaneseq }
  0x1e   :  { %241 = vmatprep.mubr.bf16.mxu0 %v579_v0  ;;  %284 = vmatprep.mubr.bf16.mxu1 %v579_v0  ;;  %v465_v2 = vld [vmem:[#allocation5 + $0x90] ss:$24 sps:$4 sm:$0xff]   ;;  %v466_v3 = vld [vmem:[#allocation5 + $0x64] ss:$24 sps:$4 sm:$0xff]   ;;  %v468_v4 = vld [vmem:[#allocation5 + $0x60] ss:$24 sps:$4 sm:$0xff]  }
  0x1f   :  { %217 = vmatprep.subr.bf16.mxu0 %v463_v1  ;;  %v469_v5 = vld [vmem:[#allocation5 + $0x34] ss:$24 sps:$4 sm:$0xff]   ;;  %v474_v7 = vld [vmem:[#allocation5 + $0x98] ss:$24 sps:$4 sm:$0xff]   ;;  %v480_v10 = vld [vmem:[#allocation5 + $0x68] ss:$24 sps:$4 sm:$0xff]  }
  0x20   :  { %218 = vmatpush1.bf16.msra.mxu0 %v465_v2  ;;  %v472_v6 = vld [vmem:[#allocation5 + $0x9c] ss:$24 sps:$4 sm:$0xff]   ;;  %v471_v8 = vld [vmem:[#allocation5 + $0x30] ss:$24 sps:$4 sm:$0xff]   ;;  %v478_v9 = vld [vmem:[#allocation5 + $0x6c] ss:$24 sps:$4 sm:$0xff]  }
  0x21   :  { %219 = vmatprep.subr.bf16.mxu0 %v466_v3  ;;  %260 = vmatprep.subr.bf16.mxu1 %v472_v6  ;;  %v475_v11 = vld [vmem:[#allocation5 + $0x4] ss:$24 sps:$4 sm:$0xff]   ;;  %v477_v12 = vld [vmem:[#allocation5] ss:$24 sps:$4 sm:$0xff]   ;;  %v44_v13 = vld [vmem:[#allocation2] sm:$0xff]  ;;  %vm205_vm0 = vcmask 523264  }
  0x22   :  { %261 = vmatpush1.bf16.msra.mxu1 %v474_v7  ;;  %v424_v15 = vmul.f32 -1.442695, %v44_v13  ;;  %v425_v16 = vmul.f32 -1.442695, %v45_v14  ;;  %v484_v17 = vld [vmem:[#allocation5 + $0x3c] ss:$24 sps:$4 sm:$0xff]  }
  0x23   :  { %262 = vmatprep.subr.bf16.mxu1 %v478_v9  ;;  %v486_v18 = vld [vmem:[#allocation5 + $0x38] ss:$24 sps:$4 sm:$0xff]   ;;  %v483_v19 = vld [vmem:[#allocation5 + $0xa4] ss:$24 sps:$4 sm:$0xff]   ;;  %v492_v21 = vld [vmem:[#allocation5 + $0x8] ss:$24 sps:$4 sm:$0xff]  }
  0x24   :  { %220 = vmatpush1.bf16.msra.mxu0 %v468_v4  ;;  %499 = vpow2.f32 %v424_v15  ;;  %v490_v20 = vld [vmem:[#allocation5 + $0xc] ss:$24 sps:$4 sm:$0xff]   ;;  %v481_v30 = vld [vmem:[#allocation5 + $0xa0] ss:$24 sps:$4 sm:$0xff]   ;;  %v487_v33 = vld [vmem:[#allocation5 + $0x70] ss:$24 sps:$4 sm:$0xff]  }
  0x25   :  { %221 = vmatprep.subr.bf16.mxu0 %v469_v5  ;;  %501 = vpow2.f32 %v425_v16  ;;  %v489_v32 = vld [vmem:[#allocation5 + $0x74] ss:$24 sps:$4 sm:$0xff]   ;;  %v495_v34 = vld [vmem:[#allocation5 + $0x44] ss:$24 sps:$4 sm:$0xff]   ;;  %v493_v35 = vld [vmem:[#allocation5 + $0x40] ss:$24 sps:$4 sm:$0xff]  }
  0x26   :  { %263 = vmatpush1.bf16.msra.mxu1 %v480_v10  ;;  %v498_v36 = vld [vmem:[#allocation5 + $0x14] ss:$24 sps:$4 sm:$0xff]   ;;  %v496_v37 = vld [vmem:[#allocation5 + $0x10] ss:$24 sps:$4 sm:$0xff]   ;;  %v341_v39 = vshrl.u32 %v340_v38, 7 }
  0x27   :  { %264 = vmatprep.subr.bf16.mxu1 %v484_v17  ;;  %v338_v41 = vld [vmem:[%s620_s2] sm:$0x3]  ;;  %s580_s2 = smov [#allocation7]  }
  0x28   :  { %222 = vmatpush1.bf16.msra.mxu0 %v471_v8  ;;  %v342_v40 = vsub.s32 0, %v341_v39  ;;  %v346_v43 = vsub.s32 1, %v341_v39  ;;  %s411_s26 = sshll.u32 %s580_s2, 4  ;;  %s412_s26 = int_to_ptr.vmem [resolvable:$true] %s411_s26 }
  0x29   :  { %223 = vmatprep.subr.bf16.mxu0 %v475_v11  ;;  %s547_s27 = scalar_lea.vmem %s412_s26, 1024  ;;  %p552_p11 = scmp.lt.s32.totalorder %s412_s26, %s412_s26 }
  0x2a   :  { %265 = vmatpush1.bf16.msra.mxu1 %v486_v18  ;;  %v343_v42 = vrot.slane %v338_v41, %v342_v40  ;;  %v347_v44 = vrot.slane %v338_v41, %v346_v43  ;;  %p548_p10 = scmp.ne.s32.totalorder %s412_s26, %s547_s27  ;;  %p553_p12 = scmp.lt.s32.totalorder %s547_s27, %s547_s27 }
  0x2b   :  { %266 = vmatprep.subr.bf16.mxu1 %v490_v20 }
  0x2c   :  { %224 = vmatpush1.bf16.msra.mxu0 %v477_v12  ;;  %352 = vst [vmem:[#allocation7 + $0x10] sm:$0xff] %v343_v42  ;;  %356 = vst [vmem:[#allocation7 + $0x30] sm:$0xff] %v343_v42  ;;  %p554_p13 = por %p553_p12, %p552_p11 }
  0x2d   :  { %303 = vmatprep.subr.bf16.mxu0 %v483_v19  ;;  %353 = vst [vmem:[#allocation7 + $0x18] sm:$0xff] %v347_v44  ;;  %357 = vst [vmem:[#allocation7 + $0x38] sm:$0xff] %v347_v44 }
  0x2e   :  { %267 = vmatpush1.bf16.msra.mxu1 %v492_v21  ;;  %p555_p0 = pnand %p554_p13, %p548_p10 }
  0x31   :  { %v500_v22 = vpop.eup %499 }
  0x32   :  { %v502_v23 = vpop.eup %501  ;;  %v52_v24 = vadd.f32 1.0, %v500_v22 }
  0x33   :  { %v53_v25 = vadd.f32 1.0, %v502_v23  ;;  %v358_v46 = vld [vmem:[#allocation7 + $0x10] sm:$0x7f] }
  0x34   :  { %503 = vrcp.f32 %v52_v24  ;;  %v359_v51 = vld [vmem:[#allocation7 + $0x18] sm:$0x7f]  ;;  %v360_v57 = vld [vmem:[#allocation7 + $0x30] sm:$0x7f] }
  0x35   :  { %505 = vrcp.f32 %v53_v25  ;;  %v361_v63 = vld [vmem:[#allocation7 + $0x38] sm:$0x7f] }
  0x41   :  { %v504_v26 = vpop.eup %503 }
  0x42   :  { %v506_v27 = vpop.eup %505  ;;  %v58_v28 = vmul.f32 %v504_v26, %v44_v13 }
  0x43   :  { %v59_v29 = vmul.f32 %v506_v27, %v45_v14 }
  0x45   :  { %v60_v31 = vpack.c.bf16 %v59_v29, %v58_v28 }
  0x47   :  { %450 = vmatmul.mubr.msk.bf16.vlgmr.msra.gmra.mxu0 %vm205_vm0, %v60_v31  ;;  %451 = vmatmul.mubr.msk.bf16.vlgmr.msra.gmra.mxu1 %vm205_vm0, %v60_v31 }
  0x48   :  { %304 = vmatpush1.bf16.msra.mxu0 %v481_v30  ;;  %327 = vmatprep.mubr.bf16.mxu0 %v579_v0 }
  0x49   :  { %305 = vmatprep.subr.bf16.mxu0 %v489_v32 }
  0x4c   :  { %306 = vmatpush1.bf16.msra.mxu0 %v487_v33 }
  0x4d   :  { %307 = vmatprep.subr.bf16.mxu0 %v495_v34 }
  0x50   :  { %308 = vmatpush1.bf16.msra.mxu0 %v493_v35 }
  0x51   :  { %309 = vmatprep.subr.bf16.mxu0 %v498_v36 }
  0x54   :  { %310 = vmatpush1.bf16.msra.mxu0 %v496_v37 }
  0x57   :  { %452 = vmatmul.mubr.msk.bf16.vlgmr.msra.gmra.mxu0 %vm205_vm0, %v60_v31 }
 0x107   :  { %v243_v45 = vpop.f32.mrf.mxu0  ;;  %v286_v47 = vpop.f32.mrf.mxu1 }
 0x108   :  { %v366_v48 = vrot.slane %v243_v45, 1  ;;  %v386_v49 = vadd.f32 %v343_v42, %v286_v47 }
 0x109   :  { %v245_v50 = vpop.f32.mrf.mxu0  ;;  %v288_v52 = vpop.f32.mrf.mxu1 }
 0x10a   :  { %v374_v53 = vadd.f32 %v366_v48, %v358_v46  ;;  %v367_v54 = vrot.slane %v245_v50, 1  ;;  %390 = vst [vmem:[#allocation7] sm:$0xff] %v386_v49  ;;  %v387_v55 = vadd.f32 %v347_v44, %v288_v52 }
 0x10b   :  { %v247_v56 = vpop.f32.mrf.mxu0  ;;  %v290_v58 = vpop.f32.mrf.mxu1 }
 0x10c   :  { %378 = vst [vmem:[#allocation7 + $0x10] sm:$0x7f] %v374_v53  ;;  %v375_v59 = vadd.f32 %v367_v54, %v359_v51  ;;  %v368_v60 = vrot.slane %v247_v56, 1  ;;  %391 = vst [vmem:[#allocation7 + $0x8] sm:$0xff] %v387_v55  ;;  %v388_v61 = vadd.f32 %v343_v42, %v290_v58 }
 0x10d   :  { %v249_v62 = vpop.f32.mrf.mxu0  ;;  %v292_v0 = vpop.f32.mrf.mxu1 }
 0x10e   :  { %379 = vst [vmem:[#allocation7 + $0x18] sm:$0x7f] %v375_v59  ;;  %v376_v1 = vadd.f32 %v368_v60, %v360_v57  ;;  %v369_v2 = vrot.slane %v249_v62, 1  ;;  %392 = vst [vmem:[#allocation7 + $0x20] sm:$0xff] %v388_v61  ;;  %v389_v3 = vadd.f32 %v347_v44, %v292_v0 }
 0x110   :  { %380 = vst [vmem:[#allocation7 + $0x30] sm:$0x7f] %v376_v1  ;;  %v377_v4 = vadd.f32 %v369_v2, %v361_v63  ;;  %393 = vst [vmem:[#allocation7 + $0x28] sm:$0xff] %v389_v3 }
 0x112   :  { %381 = vst [vmem:[#allocation7 + $0x38] sm:$0x7f] %v377_v4 }
 0x113   :  { %v394_v6 = vld [vmem:[#allocation7 + $0x10] sm:$0x7f] }
 0x115   :  { %v395_v9 = vld [vmem:[#allocation7 + $0x18] sm:$0x7f] }
 0x117   :  { %v329_v5 = vpop.f32.mrf.mxu0  ;;  %v396_v12 = vld [vmem:[#allocation7 + $0x30] sm:$0x7f] }
 0x118   :  { %v398_v7 = vadd.f32 %v394_v6, %v329_v5 }
 0x119   :  { %v331_v8 = vpop.f32.mrf.mxu0  ;;  %v397_v15 = vld [vmem:[#allocation7 + $0x38] sm:$0x7f] }
 0x11a   :  { %402 = vst [vmem:[#allocation7 + $0x10] sm:$0x7f] %v398_v7  ;;  %v399_v10 = vadd.f32 %v395_v9, %v331_v8 }
 0x11b   :  { %v333_v11 = vpop.f32.mrf.mxu0 }
 0x11c   :  { %403 = vst [vmem:[#allocation7 + $0x18] sm:$0x7f] %v399_v10  ;;  %v400_v13 = vadd.f32 %v396_v12, %v333_v11 }
 0x11d   :  { %v335_v14 = vpop.f32.mrf.mxu0 }
 0x11e   :  { %404 = vst [vmem:[#allocation7 + $0x30] sm:$0x7f] %v400_v13  ;;  %v401_v16 = vadd.f32 %v397_v15, %v335_v14 }
 0x120   :  { %405 = vst [vmem:[#allocation7 + $0x38] sm:$0x7f] %v401_v16 }
 0x121   :  { %558 = shalt.err (!%p555_p0)
}
 0x122   :  { %s581_s28 = smov 256   ;;  %s582_s29 = smov 16  }
 0x123   :  { %417 = dma.vmem_to_hbm [thread:$0]  %s412_s26, 1024, %s621_s3, [#allocation4], %s581_s28, %s581_s28, %s582_s29  }
 0x124   :  { %571 = dma.done.wait [#allocation4], 1024  }
 0x125   :  { %572 = vsyncadd [#allocation4], 4294966272 }
 0x126   :  { %421 = vsyncpa [#allocation3], 1 }
 0x127   :  { %422 = vsyncpa [#allocation6], 1 }
 0x128   :  { %423 = vsyncpa [#allocation4], 1 }

</bundles_post_ra>
